<compile_context>
chip_gen: v7x
topology: tpu7x:2x2x1
jax: 0.10.0
libtpu: 0.0.40
codegen_flags: <defaults>
</compile_context>

<pallas_src>
import functools

import jax
import jax.numpy as jnp
from jax.experimental import pallas as pl
from jax.experimental.pallas import tpu as pltpu


def _round_up(x, m):
    return (x + m - 1) // m * m


def gnetwork_kernel(in_dim, out_dim, r_w1, r_b1, r_w2, r_b2,
                    x_ref, p_ref, o_ref):
    """x_ref: (B, in_dim); p_ref: packed param slab (rows, lanes); o_ref: (B, out_dim)."""
    lanes = p_ref.shape[1]
    x = x_ref[...]                                  # (B, in_dim)

    # Full-lane, tile-aligned slab reads (unmasked vld); padding lanes/rows are 0.
    w1 = p_ref[r_w1:r_w1 + in_dim, :]               # (in_dim, lanes)
    b1 = p_ref[r_b1:r_b1 + 1, :]                    # (1, lanes)
    w2 = p_ref[r_w2:r_w2 + lanes, :]                # (lanes, lanes)
    b2 = p_ref[r_b2:r_b2 + 1, :]                    # (1, lanes)

    # fc1 + ReLU.  K == 1 -> VPU broadcast multiply, never the MXU.
    if in_dim == 1:
        h = x * w1 + b1                             # (B,1)*(1,lanes) -> (B,lanes)
    else:
        h = jnp.dot(x, w1, preferred_element_type=jnp.float32) + b1
    h = jnp.maximum(h, 0.0)                         # padded lanes stay exactly 0

    # fc2: one (B,128)@(128,128) vmatmul; zero-padded K rows / N lanes are inert.
    y = jnp.dot(h, w2, preferred_element_type=jnp.float32) + b2

    # Store only the useful lanes; small masked vst, no wrapper-side slice op.
    o_ref[...] = y[:, :out_dim]


def pack_params(w1, b1, w2, b2, lanes):
    """Pack [w1; b1; w2; b2] into one lane-dense f32 slab.  Call ONCE at init /
    weight-update time.  Each section starts on an 8-row (sublane) boundary and
    is zero-padded to `lanes` (>=128) columns; the w2 section is additionally
    zero-padded to `lanes` rows so fc2 is a full (lanes, lanes) MXU operand."""
    def section(a, min_rows=1):
        rows, cols = a.shape
        rpad = _round_up(max(rows, min_rows), 8) - rows
        return jnp.pad(a.astype(jnp.float32), ((0, rpad), (0, lanes - cols)))

    w1s = section(w1)
    b1s = section(b1.reshape(1, -1))
    w2s = section(w2, min_rows=lanes)               # zero K-rows beyond hidden_dim
    b2s = section(b2.reshape(1, -1))

    r_w1 = 0
    r_b1 = r_w1 + w1s.shape[0]
    r_w2 = r_b1 + b1s.shape[0]
    r_b2 = r_w2 + w2s.shape[0]
    slab = jnp.concatenate([w1s, b1s, w2s, b2s], axis=0)
    return slab, (r_w1, r_b1, r_w2, r_b2)


def prepare_gnetwork(w1, b1, w2, b2):
    """One-time packing of the GNetwork parameters (hoisted out of the forward)."""
    in_dim, hidden_dim = w1.shape
    _, out_dim = w2.shape
    # Lane width: multiple of 128 covering both hidden and output widths.
    lanes = _round_up(max(hidden_dim, out_dim), 128)
    slab, offsets = pack_params(w1, b1, w2, b2, lanes)
    dims = (in_dim, hidden_dim, out_dim, lanes)
    return slab, offsets, dims


def gnetwork_forward(x, slab, offsets, dims):
    """Forward pass using the pre-packed parameter slab from prepare_gnetwork."""
    in_dim, hidden_dim, out_dim, lanes = dims
    r_w1, r_b1, r_w2, r_b2 = offsets
    B = x.shape[0]

    kernel = functools.partial(
        gnetwork_kernel, in_dim, out_dim, r_w1, r_b1, r_w2, r_b2)

    # grid=() single step; everything resident in VMEM (slab is ~76 KiB).
    vmem = pl.BlockSpec(memory_space=pltpu.MemorySpace.VMEM)
    return pl.pallas_call(
        kernel,
        out_shape=jax.ShapeDtypeStruct((B, out_dim), jnp.float32),
        in_specs=[vmem, vmem],
        out_specs=vmem,
    )(x, slab)


def init_params(key, input_dim=1, hidden_dim=32, output_dim=8):
    # Deterministic init mirroring nn.Linear's U(-1/sqrt(fan_in), 1/sqrt(fan_in)).
    k1, k2, k3, k4 = jax.random.split(key, 4)
    bound1 = 1.0 / (input_dim ** 0.5)
    bound2 = 1.0 / (hidden_dim ** 0.5)
    w1 = jax.random.uniform(k1, (input_dim, hidden_dim), jnp.float32, -bound1, bound1)
    b1 = jax.random.uniform(k2, (1, hidden_dim), jnp.float32, -bound1, bound1)
    w2 = jax.random.uniform(k3, (hidden_dim, output_dim), jnp.float32, -bound2, bound2)
    b2 = jax.random.uniform(k4, (1, output_dim), jnp.float32, -bound2, bound2)
    return w1, b1, w2, b2


if __name__ == "__main__":
    key = jax.random.PRNGKey(0)
    k_x, k_p = jax.random.split(key)

    input_dim, hidden_dim, output_dim = 1, 32, 8
    batch = 8

    x = jax.random.normal(k_x, (batch, input_dim), jnp.float32)
    w1, b1, w2, b2 = init_params(k_p, input_dim, hidden_dim, output_dim)

    # Pack once (init / weight-update time); reuse across every forward call.
    slab, offsets, dims = prepare_gnetwork(w1, b1, w2, b2)
    slab = jax.block_until_ready(slab)

    out = gnetwork_forward(x, slab, offsets, dims)
    jax.block_until_ready(out)

    # Pure-JAX reference check (same math as the PyTorch forward).
    ref = jnp.maximum(x @ w1 + b1, 0.0) @ w2 + b2
    assert out.shape == (batch, output_dim)
    assert jnp.allclose(out, ref, atol=1e-5, rtol=1e-5)

    print("KERNEL_OK")
</pallas_src>

<mosaic_0001>
module attributes {stable_mosaic.version = 11 : i64} {
  func.func @gnetwork_kernel(%arg0: memref<8x1xf32, #tpu.memory_space<vmem>>, %arg1: memref<152x128xf32, #tpu.memory_space<vmem>>, %arg2: memref<8x8xf32, #tpu.memory_space<vmem>>) attributes {dimension_semantics = [], scalar_prefetch = 0 : i64, scratch_operands = 0 : i64, tpu.core_type = #tpu.core_type<tc>} {
    %c0 = arith.constant 0 : index
    %c0_0 = arith.constant 0 : index
    %0 = vector.load %arg0[%c0, %c0_0] : memref<8x1xf32, #tpu.memory_space<vmem>>, vector<8x1xf32>
    %c0_1 = arith.constant 0 : index
    %c0_2 = arith.constant 0 : index
    %1 = vector.load %arg1[%c0_1, %c0_2] : memref<152x128xf32, #tpu.memory_space<vmem>>, vector<1x128xf32>
    %c8 = arith.constant 8 : index
    %c0_3 = arith.constant 0 : index
    %2 = vector.load %arg1[%c8, %c0_3] : memref<152x128xf32, #tpu.memory_space<vmem>>, vector<1x128xf32>
    %c16 = arith.constant 16 : index
    %c0_4 = arith.constant 0 : index
    %3 = vector.load %arg1[%c16, %c0_4] : memref<152x128xf32, #tpu.memory_space<vmem>>, vector<128x128xf32>
    %c144 = arith.constant 144 : index
    %c0_5 = arith.constant 0 : index
    %4 = vector.load %arg1[%c144, %c0_5] : memref<152x128xf32, #tpu.memory_space<vmem>>, vector<1x128xf32>
    %5 = vector.broadcast %0 : vector<8x1xf32> to vector<8x128xf32>
    %6 = vector.broadcast %1 : vector<1x128xf32> to vector<8x128xf32>
    %7 = arith.mulf %5, %6 : vector<8x128xf32>
    %8 = vector.broadcast %2 : vector<1x128xf32> to vector<8x128xf32>
    %9 = arith.addf %7, %8 : vector<8x128xf32>
    %cst = arith.constant 0.000000e+00 : f32
    %10 = vector.broadcast %cst : f32 to vector<8x128xf32>
    %11 = arith.maximumf %9, %10 : vector<8x128xf32>
    %cst_6 = arith.constant dense<0.000000e+00> : vector<8x128xf32>
    %12 = tpu.matmul %11, %3, %cst_6 {dimension_numbers = #tpu.dot_dimension_numbers<[1], [0], [0], [1], [0, 0, 1, 1], [], []>} : vector<8x128xf32>, vector<128x128xf32>, vector<8x128xf32> -> vector<8x128xf32>
    %13 = vector.broadcast %4 : vector<1x128xf32> to vector<8x128xf32>
    %14 = arith.addf %12, %13 : vector<8x128xf32>
    %15 = vector.extract_strided_slice %14 {offsets = [0, 0], sizes = [8, 8], strides = [1, 1]} : vector<8x128xf32> to vector<8x8xf32>
    %c0_7 = arith.constant 0 : index
    %c0_8 = arith.constant 0 : index
    %16 = vector.load %arg2[%c0_7, %c0_8] : memref<8x8xf32, #tpu.memory_space<vmem>>, vector<8x8xf32>
    tpu.vector_store %arg2[%c0_7, %c0_8], %15 {strides = array<i32>} : memref<8x8xf32, #tpu.memory_space<vmem>>, vector<8x8xf32>,
    return
  }
}

</mosaic_0001>

<bundles_post_ra>
// kernel: tpu_custom_call.1
= control target key start
LH: loop header
LB: loop body
LE: loop exit
PB: predicated region body
PF: predicated region fallthrough
CT: control target
= control target key end

     0   :  { %7 = vsyncpa [#allocation3], 0  ;;  %s339_s0 = inlined_call_operand.vmem [shape: f32[8,1], index: 0, kind: input, shape index: {}]   ;;  %s340_s1 = inlined_call_operand.hbm [shape: f32[152,128], index: 1, kind: input, shape index: {}]   ;;  %s341_s2 = inlined_call_operand.hbm [shape: f32[8,8], index: 2, kind: output, shape index: {}]  }
   0x1   :  { %8 = vsyncpa [#allocation4], 0  ;;  %s289_s9 = smov [#allocation2]   ;;  %s241_s13 = scalar_lea.hbm %s340_s1, 2432 }
   0x2   :  { %s16_s10 = sshll.u32 %s289_s9, 4  ;;  %p242_p0 = scmp.ne.s32.totalorder %s340_s1, %s241_s13  ;;  %s17_s10 = int_to_ptr.vmem [resolvable:$true] %s16_s10 }
   0x3   :  { %p245_p1 = scmp.lt.u32.totalorder %s241_s13, %s340_s1 }
   0x5   :  { %p247_p2 = pnand %p245_p1, %p242_p0 }
   0x7   :  { %250 = shalt.err (!%p247_p2)
}
   0x8   :  { %s251_s18 = scalar_lea.vmem %s17_s10, 2432  ;;  %p256_p4 = scmp.lt.s32.totalorder %s17_s10, %s17_s10 }
   0x9   :  { %p252_p3 = scmp.ne.s32.totalorder %s17_s10, %s251_s18  ;;  %p257_p5 = scmp.lt.s32.totalorder %s251_s18, %s251_s18 }
   0xb   :  { %p258_p6 = por %p257_p5, %p256_p4 }
   0xd   :  { %p259_p7 = pnand %p258_p6, %p252_p3 }
   0xf   :  { %262 = shalt.err (!%p259_p7)
}
  0x10   :  { %s290_s19 = smov 128   ;;  %s291_s20 = smov 8  }
  0x11   :  { %22 = dma.hbm_to_vmem [thread:$0]  %s340_s1, 2432, %s17_s10, [#allocation3], %s290_s19, %s290_s19, %s291_s20  }
  0x12   :  { %285 = dma.done.wait [#allocation3], 2432  }
  0x13   :  { %286 = vsyncadd [#allocation3], 4294964864  ;;  %v292_v0 = vmov 0   ;;  %v293_v1 = vmov 0.0|0.0   ;;  %v26_v2 = vld [vmem:[%s339_s0] sm:$0xff]  ;;  %v29_v3 = vld [vmem:[#allocation2 + $0x10] sm:$0xff] }
  0x14   :  { %240 = vset.pattern.permute.xlu0 %v292_v0  ;;  %208 = vmatprep.subr.bf16.mxu0 %v293_v1  ;;  %v30_v4 = vld [vmem:[#allocation2 + $0x18] sm:$0xff]  ;;  %v31_v6 = vld [vmem:[#allocation2 + $0x20] sm:$0xff]  ;;  %v32_v7 = vld [vmem:[#allocation2 + $0x28] sm:$0xff]  ;;  %vm294_vm0 = vmmov 0   ;;  %v295_v12 = vmov 0.0   ;;  %s296_s0 = smov [#allocation5]  }
  0x15   :  { %48 = vperm.xlu0 %240, %v26_v2   ;;  %v209_v5 = vpack.c.bf16 %v30_v4, %v29_v3  ;;  %v212_v8 = vpack.c.bf16 %v32_v7, %v31_v6  ;;  %v33_v9 = vld [vmem:[#allocation2 + $0x30] sm:$0xff]  ;;  %v34_v10 = vld [vmem:[#allocation2 + $0x38] sm:$0xff]  ;;  %205 = vmatprep.mubr.msk.f32.mxu0 %vm294_vm0, %v295_v12  ;;  %v35_v13 = vld [vmem:[#allocation2 + $0x40] sm:$0xff]  ;;  %s144_s1 = sshll.u32 %s296_s0, 4  ;;  %vm136_vm1 = vcmask 64512   ;;  %s145_s1 = int_to_ptr.vmem [resolvable:$true] %s144_s1 }
  0x16   :  { %v215_v11 = vpack.c.bf16 %v34_v10, %v33_v9  ;;  %v36_v14 = vld [vmem:[#allocation2 + $0x48] sm:$0xff]  ;;  %v37_v16 = vld [vmem:[#allocation2 + $0x50] sm:$0xff]  ;;  %v38_v17 = vld [vmem:[#allocation2 + $0x58] sm:$0xff]  ;;  %s263_s25 = scalar_lea.vmem %s145_s1, 128  ;;  %p268_p9 = scmp.lt.s32.totalorder %s145_s1, %s145_s1 }
  0x17   :  { %210 = vmatpush3.bf16.msra.mxu0 %v209_v5  ;;  %v218_v15 = vpack.c.bf16 %v36_v14, %v35_v13  ;;  %v221_v18 = vpack.c.bf16 %v38_v17, %v37_v16  ;;  %v39_v19 = vld [vmem:[#allocation2 + $0x60] sm:$0xff]  ;;  %v40_v20 = vld [vmem:[#allocation2 + $0x68] sm:$0xff]  ;;  %v41_v22 = vld [vmem:[#allocation2 + $0x70] sm:$0xff]  ;;  %p264_p8 = scmp.ne.s32.totalorder %s145_s1, %s263_s25  ;;  %p269_p10 = scmp.lt.s32.totalorder %s263_s25, %s263_s25 }
  0x18   :  { %211 = vmatprep.subr.bf16.mxu0 %v293_v1  ;;  %v224_v21 = vpack.c.bf16 %v40_v20, %v39_v19  ;;  %v42_v23 = vld [vmem:[#allocation2 + $0x78] sm:$0xff]  ;;  %v43_v25 = vld [vmem:[#allocation2 + $0x80] sm:$0xff]  ;;  %v44_v26 = vld [vmem:[#allocation2 + $0x88] sm:$0xff] }
  0x19   :  { %v227_v24 = vpack.c.bf16 %v42_v23, %v41_v22  ;;  %v230_v27 = vpack.c.bf16 %v44_v26, %v43_v25  ;;  %v153_v28 = vld [vmem:[#allocation2] ss:$0 sm:$0xff]  ;;  %v154_v29 = vld [vmem:[#allocation2 + $0x8] ss:$0 sm:$0xff]  ;;  %v155_v34 = vld [vmem:[#allocation2 + $0x90] ss:$0 sm:$0xff]  ;;  %p270_p11 = por %p269_p10, %p268_p9 }
  0x1b   :  { %213 = vmatpush3.bf16.msra.mxu0 %v212_v8  ;;  %p271_p12 = pnand %p270_p11, %p264_p8 }
  0x1c   :  { %214 = vmatprep.subr.bf16.mxu0 %v293_v1 }
  0x1f   :  { %216 = vmatpush3.bf16.msra.mxu0 %v215_v11 }
  0x20   :  { %217 = vmatprep.subr.bf16.mxu0 %v293_v1 }
  0x23   :  { %219 = vmatpush3.bf16.msra.mxu0 %v218_v15 }
  0x24   :  { %220 = vmatprep.subr.bf16.mxu0 %v293_v1 }
  0x27   :  { %222 = vmatpush3.bf16.msra.mxu0 %v221_v18 }
  0x28   :  { %223 = vmatprep.subr.bf16.mxu0 %v293_v1 }
  0x2b   :  { %225 = vmatpush3.bf16.msra.mxu0 %v224_v21 }
  0x2c   :  { %226 = vmatprep.subr.bf16.mxu0 %v293_v1 }
  0x2f   :  { %228 = vmatpush3.bf16.msra.mxu0 %v227_v24 }
  0x30   :  { %229 = vmatprep.subr.bf16.mxu0 %v293_v1 }
  0x33   :  { %231 = vmatpush3.bf16.msra.mxu0 %v230_v27 }
  0x94   :  { %v49_v30 = vpop.permute.xlu0 %48 }
  0x95   :  { %v55_v31 = vmul.f32 %v153_v28, %v49_v30 }
  0x97   :  { %v60_v32 = vadd.f32 %v154_v29, %v55_v31 }
  0x99   :  { %v61_v33 = vmax.f32 %v60_v32, 0.0 }
  0x9b   :  { %206 = vmatmul.mubr.f32.vlgmr.msra.gmra.mrb[0].mxu0 %v61_v33 }
 0x16e   :  { %v132_v35 = vpop.f32.mrb[0].mxu0 }
 0x16f   :  { %v133_v36 = vadd.f32 %v155_v34, %v132_v35  ;;  %v207_v37 = vpop.f32.mrb[1].mxu0 }
 0x171   :  { %137 = vst.msk [vmem:[#allocation5] sm:$0xff] %vm136_vm1, %v133_v36 }
 0x172   :  { %274 = shalt.err (!%p271_p12)
}
 0x173   :  { %s275_s28 = scalar_lea.hbm %s341_s2, 128 }
 0x174   :  { %p276_p13 = scmp.ne.s32.totalorder %s341_s2, %s275_s28  ;;  %p279_p0 = scmp.lt.u32.totalorder %s275_s28, %s341_s2 }
 0x176   :  { %p281_p1 = pnand %p279_p0, %p276_p13 }
 0x178   :  { %284 = shalt.err (!%p281_p1)
}
 0x179   :  { %147 = dma.vmem_to_hbm [thread:$0]  %s145_s1, 128, %s341_s2, [#allocation4]  }
 0x17a   :  { %287 = dma.done.wait [#allocation4], 128  }
 0x17b   :  { %288 = vsyncadd [#allocation4], 4294967168 }
 0x17c   :  { %151 = vsyncpa [#allocation3], 1 }
 0x17d   :  { %152 = vsyncpa [#allocation4], 1 }

</bundles_post_ra>
